<compile_context>
chip_gen: v7x
topology: tpu7x:2x2x1
jax: 0.10.0
libtpu: 0.0.40
codegen_flags: <defaults>
</compile_context>

<pallas_src>
import jax
import jax.numpy as jnp
from jax.experimental import pallas as pl
from jax.experimental.pallas import tpu as pltpu

BN_EPS = 1e-5
LANE = 128


def _round_up(n, m):
    return (n + m - 1) // m * m


def _bn_relu(h, gamma, beta):
    """Training-mode BatchNorm1d (batch mean, biased var) + ReLU, f32 math."""
    mean = jnp.mean(h, axis=0, keepdims=True)
    mean_sq = jnp.mean(h * h, axis=0, keepdims=True)
    var = jnp.maximum(mean_sq - mean * mean, 0.0)        # single-pass, fp-clamped
    hhat = (h - mean) * jax.lax.rsqrt(var + BN_EPS)      # rsqrt -> EUP
    return jnp.maximum(hhat * gamma + beta, 0.0)


def basic_block_kernel(x_ref, w1_ref, g1_ref, be1_ref, w2_ref, g2_ref, be2_ref,
                       out_ref):
    # Linear(in,in) -> BN -> ReLU -> Linear(in,out) -> BN -> ReLU
    # (Linear biases omitted: exact no-ops before training-mode BN.)
    h = jnp.dot(x_ref[...], w1_ref[...], preferred_element_type=jnp.float32)
    h = _bn_relu(h, g1_ref[...], be1_ref[...])
    h2 = jnp.dot(h.astype(jnp.bfloat16), w2_ref[...],
                 preferred_element_type=jnp.float32)
    out_ref[...] = _bn_relu(h2, g2_ref[...], be2_ref[...])


def linearnet_basic_block(x, params):
    """x: (B, in_features) f32. params from init_params. Returns (B, out_features) f32."""
    B, in_f = x.shape
    out_f = params["w2"].shape[1]
    in_p = _round_up(in_f, LANE)
    out_p = _round_up(out_f, LANE)

    def pad2(a, rows, cols, fill=0.0):
        return jnp.pad(a, ((0, rows - a.shape[0]), (0, cols - a.shape[1])),
                       constant_values=fill)

    # MXU operands in bf16 (f32 accumulate in-kernel); BN affine params in f32.
    x_p = pad2(x, B, in_p).astype(jnp.bfloat16)
    w1_p = pad2(params["w1"], in_p, in_p).astype(jnp.bfloat16)
    w2_p = pad2(params["w2"], in_p, out_p).astype(jnp.bfloat16)
    g1_p = pad2(params["g1"], 1, in_p, fill=1.0)
    be1_p = pad2(params["be1"], 1, in_p)
    g2_p = pad2(params["g2"], 1, out_p, fill=1.0)
    be2_p = pad2(params["be2"], 1, out_p)

    vmem = pl.BlockSpec(memory_space=pltpu.MemorySpace.VMEM)
    out_padded = pl.pallas_call(
        basic_block_kernel,
        out_shape=jax.ShapeDtypeStruct((B, out_p), jnp.float32),
        in_specs=[vmem] * 7,
        out_specs=vmem,
        compiler_params=pltpu.CompilerParams(vmem_limit_bytes=48 * 1024 * 1024),
    )(x_p, w1_p, g1_p, be1_p, w2_p, g2_p, be2_p)

    # Padded feature columns are exactly zero by construction; slice them off.
    return out_padded[:, :out_f]


def init_params(key, in_features, out_features):
    """PyTorch-style init. Linear weights stored pre-transposed as (in, out)."""
    def lin(k, fan_in, fan_out):
        k1, k2 = jax.random.split(k)
        bound = 1.0 / jnp.sqrt(fan_in)
        w = jax.random.uniform(k1, (fan_in, fan_out), jnp.float32, -bound, bound)
        b = jax.random.uniform(k2, (1, fan_out), jnp.float32, -bound, bound)
        return w, b

    k1, k2 = jax.random.split(key)
    w1, b1 = lin(k1, in_features, in_features)     # block Linear 1
    w2, b2 = lin(k2, in_features, out_features)    # block Linear 2
    return dict(
        w1=w1, b1=b1, g1=jnp.ones((1, in_features), jnp.float32),
        be1=jnp.zeros((1, in_features), jnp.float32),
        w2=w2, b2=b2, g2=jnp.ones((1, out_features), jnp.float32),
        be2=jnp.zeros((1, out_features), jnp.float32),
    )


def reference(x, params):
    """Pure-JAX reference (keeps the Linear biases; same bf16 matmul operands)."""
    def bn(h, g, b):
        mean = jnp.mean(h, axis=0, keepdims=True)
        var = jnp.mean((h - mean) ** 2, axis=0, keepdims=True)   # biased, like PyTorch
        return (h - mean) * jax.lax.rsqrt(var + BN_EPS) * g + b

    h = jnp.dot(x.astype(jnp.bfloat16), params["w1"].astype(jnp.bfloat16),
                preferred_element_type=jnp.float32) + params["b1"]
    h = jnp.maximum(bn(h, params["g1"], params["be1"]), 0.0)
    h2 = jnp.dot(h.astype(jnp.bfloat16), params["w2"].astype(jnp.bfloat16),
                 preferred_element_type=jnp.float32) + params["b2"]
    return jnp.maximum(bn(h2, params["g2"], params["be2"]), 0.0)


if __name__ == "__main__":
    key = jax.random.PRNGKey(0)
    k_x, k_p = jax.random.split(key)

    B, IN_F, OUT_F = 8, 32, 16
    x = jax.random.normal(k_x, (B, IN_F), jnp.float32)
    params = init_params(k_p, IN_F, OUT_F)

    out = linearnet_basic_block(x, params)
    out = jax.block_until_ready(out)

    ref = jax.block_until_ready(reference(x, params))

    assert out.shape == (B, OUT_F)
    assert bool(jnp.all(jnp.isfinite(out)))
    assert bool(jnp.all(out >= 0.0))                      # ends in ReLU
    assert jnp.allclose(out, ref, atol=5e-2, rtol=5e-2)   # bias-before-BN cancels exactly
    print("KERNEL_OK")
</pallas_src>

<mosaic_0001>
module attributes {stable_mosaic.version = 11 : i64} {
  func.func @basic_block_kernel(%arg0: memref<8x128xbf16, #tpu.memory_space<vmem>>, %arg1: memref<128x128xbf16, #tpu.memory_space<vmem>>, %arg2: memref<1x128xf32, #tpu.memory_space<vmem>>, %arg3: memref<1x128xf32, #tpu.memory_space<vmem>>, %arg4: memref<128x128xbf16, #tpu.memory_space<vmem>>, %arg5: memref<1x128xf32, #tpu.memory_space<vmem>>, %arg6: memref<1x128xf32, #tpu.memory_space<vmem>>, %arg7: memref<8x128xf32, #tpu.memory_space<vmem>>) attributes {dimension_semantics = [], scalar_prefetch = 0 : i64, scratch_operands = 0 : i64, tpu.core_type = #tpu.core_type<tc>} {
    %c0 = arith.constant 0 : index
    %c0_0 = arith.constant 0 : index
    %0 = vector.load %arg0[%c0, %c0_0] : memref<8x128xbf16, #tpu.memory_space<vmem>>, vector<8x128xbf16>
    %c0_1 = arith.constant 0 : index
    %c0_2 = arith.constant 0 : index
    %1 = vector.load %arg1[%c0_1, %c0_2] : memref<128x128xbf16, #tpu.memory_space<vmem>>, vector<128x128xbf16>
    %cst = arith.constant dense<0.000000e+00> : vector<8x128xf32>
    %2 = tpu.matmul %0, %1, %cst {dimension_numbers = #tpu.dot_dimension_numbers<[1], [0], [0], [1], [0, 0, 1, 1], [], []>} : vector<8x128xbf16>, vector<128x128xbf16>, vector<8x128xf32> -> vector<8x128xf32>
    %c0_3 = arith.constant 0 : index
    %c0_4 = arith.constant 0 : index
    %3 = vector.load %arg2[%c0_3, %c0_4] : memref<1x128xf32, #tpu.memory_space<vmem>>, vector<1x128xf32>
    %c0_5 = arith.constant 0 : index
    %c0_6 = arith.constant 0 : index
    %4 = vector.load %arg3[%c0_5, %c0_6] : memref<1x128xf32, #tpu.memory_space<vmem>>, vector<1x128xf32>
    %cst_7 = arith.constant dense<0.000000e+00> : vector<128xf32>
    %5 = vector.multi_reduction <add>, %2, %cst_7 [0] : vector<8x128xf32> to vector<128xf32>
    %6 = vector.shape_cast %5 : vector<128xf32> to vector<1x128xf32>
    %cst_8 = arith.constant 8.000000e+00 : f32
    %7 = vector.broadcast %cst_8 : f32 to vector<1x128xf32>
    %8 = arith.divf %6, %7 : vector<1x128xf32>
    %9 = arith.mulf %2, %2 : vector<8x128xf32>
    %cst_9 = arith.constant dense<0.000000e+00> : vector<128xf32>
    %10 = vector.multi_reduction <add>, %9, %cst_9 [0] : vector<8x128xf32> to vector<128xf32>
    %11 = vector.shape_cast %10 : vector<128xf32> to vector<1x128xf32>
    %cst_10 = arith.constant 8.000000e+00 : f32
    %12 = vector.broadcast %cst_10 : f32 to vector<1x128xf32>
    %13 = arith.divf %11, %12 : vector<1x128xf32>
    %14 = arith.mulf %8, %8 : vector<1x128xf32>
    %15 = arith.subf %13, %14 : vector<1x128xf32>
    %cst_11 = arith.constant 0.000000e+00 : f32
    %16 = vector.broadcast %cst_11 : f32 to vector<1x128xf32>
    %17 = arith.maximumf %15, %16 : vector<1x128xf32>
    %18 = vector.broadcast %8 : vector<1x128xf32> to vector<8x128xf32>
    %19 = arith.subf %2, %18 : vector<8x128xf32>
    %cst_12 = arith.constant 9.99999974E-6 : f32
    %20 = vector.broadcast %cst_12 : f32 to vector<1x128xf32>
    %21 = arith.addf %17, %20 : vector<1x128xf32>
    %22 = math.rsqrt %21 : vector<1x128xf32>
    %23 = vector.broadcast %22 : vector<1x128xf32> to vector<8x128xf32>
    %24 = arith.mulf %19, %23 : vector<8x128xf32>
    %25 = vector.broadcast %3 : vector<1x128xf32> to vector<8x128xf32>
    %26 = arith.mulf %24, %25 : vector<8x128xf32>
    %27 = vector.broadcast %4 : vector<1x128xf32> to vector<8x128xf32>
    %28 = arith.addf %26, %27 : vector<8x128xf32>
    %cst_13 = arith.constant 0.000000e+00 : f32
    %29 = vector.broadcast %cst_13 : f32 to vector<8x128xf32>
    %30 = arith.maximumf %28, %29 : vector<8x128xf32>
    %31 = arith.truncf %30 : vector<8x128xf32> to vector<8x128xbf16>
    %c0_14 = arith.constant 0 : index
    %c0_15 = arith.constant 0 : index
    %32 = vector.load %arg4[%c0_14, %c0_15] : memref<128x128xbf16, #tpu.memory_space<vmem>>, vector<128x128xbf16>
    %cst_16 = arith.constant dense<0.000000e+00> : vector<8x128xf32>
    %33 = tpu.matmul %31, %32, %cst_16 {dimension_numbers = #tpu.dot_dimension_numbers<[1], [0], [0], [1], [0, 0, 1, 1], [], []>} : vector<8x128xbf16>, vector<128x128xbf16>, vector<8x128xf32> -> vector<8x128xf32>
    %c0_17 = arith.constant 0 : index
    %c0_18 = arith.constant 0 : index
    %34 = vector.load %arg5[%c0_17, %c0_18] : memref<1x128xf32, #tpu.memory_space<vmem>>, vector<1x128xf32>
    %c0_19 = arith.constant 0 : index
    %c0_20 = arith.constant 0 : index
    %35 = vector.load %arg6[%c0_19, %c0_20] : memref<1x128xf32, #tpu.memory_space<vmem>>, vector<1x128xf32>
    %cst_21 = arith.constant dense<0.000000e+00> : vector<128xf32>
    %36 = vector.multi_reduction <add>, %33, %cst_21 [0] : vector<8x128xf32> to vector<128xf32>
    %37 = vector.shape_cast %36 : vector<128xf32> to vector<1x128xf32>
    %cst_22 = arith.constant 8.000000e+00 : f32
    %38 = vector.broadcast %cst_22 : f32 to vector<1x128xf32>
    %39 = arith.divf %37, %38 : vector<1x128xf32>
    %40 = arith.mulf %33, %33 : vector<8x128xf32>
    %cst_23 = arith.constant dense<0.000000e+00> : vector<128xf32>
    %41 = vector.multi_reduction <add>, %40, %cst_23 [0] : vector<8x128xf32> to vector<128xf32>
    %42 = vector.shape_cast %41 : vector<128xf32> to vector<1x128xf32>
    %cst_24 = arith.constant 8.000000e+00 : f32
    %43 = vector.broadcast %cst_24 : f32 to vector<1x128xf32>
    %44 = arith.divf %42, %43 : vector<1x128xf32>
    %45 = arith.mulf %39, %39 : vector<1x128xf32>
    %46 = arith.subf %44, %45 : vector<1x128xf32>
    %cst_25 = arith.constant 0.000000e+00 : f32
    %47 = vector.broadcast %cst_25 : f32 to vector<1x128xf32>
    %48 = arith.maximumf %46, %47 : vector<1x128xf32>
    %49 = vector.broadcast %39 : vector<1x128xf32> to vector<8x128xf32>
    %50 = arith.subf %33, %49 : vector<8x128xf32>
    %cst_26 = arith.constant 9.99999974E-6 : f32
    %51 = vector.broadcast %cst_26 : f32 to vector<1x128xf32>
    %52 = arith.addf %48, %51 : vector<1x128xf32>
    %53 = math.rsqrt %52 : vector<1x128xf32>
    %54 = vector.broadcast %53 : vector<1x128xf32> to vector<8x128xf32>
    %55 = arith.mulf %50, %54 : vector<8x128xf32>
    %56 = vector.broadcast %34 : vector<1x128xf32> to vector<8x128xf32>
    %57 = arith.mulf %55, %56 : vector<8x128xf32>
    %58 = vector.broadcast %35 : vector<1x128xf32> to vector<8x128xf32>
    %59 = arith.addf %57, %58 : vector<8x128xf32>
    %cst_27 = arith.constant 0.000000e+00 : f32
    %60 = vector.broadcast %cst_27 : f32 to vector<8x128xf32>
    %61 = arith.maximumf %59, %60 : vector<8x128xf32>
    %c0_28 = arith.constant 0 : index
    %c0_29 = arith.constant 0 : index
    %62 = vector.load %arg7[%c0_28, %c0_29] : memref<8x128xf32, #tpu.memory_space<vmem>>, vector<8x128xf32>
    tpu.vector_store %arg7[%c0_28, %c0_29], %61 {strides = array<i32>} : memref<8x128xf32, #tpu.memory_space<vmem>>, vector<8x128xf32>,
    return
  }
}

</mosaic_0001>

<bundles_post_ra>
// kernel: tpu_custom_call.1
= control target key start
LH: loop header
LB: loop body
LE: loop exit
PB: predicated region body
PF: predicated region fallthrough
CT: control target
= control target key end

     0   :  { %12 = vsyncpa [#allocation3], 0  ;;  %s687_s0 = inlined_call_operand.hbm [shape: bf16[8,128], index: 0, kind: input, shape index: {}]   ;;  %s688_s1 = inlined_call_operand.hbm [shape: bf16[128,128], index: 1, kind: input, shape index: {}]   ;;  %s689_s2 = inlined_call_operand.vmem [shape: f32[1,128], index: 2, kind: input, shape index: {}]   ;;  %s690_s3 = inlined_call_operand.vmem [shape: f32[1,128], index: 3, kind: input, shape index: {}]   ;;  %s691_s4 = inlined_call_operand.hbm [shape: bf16[128,128], index: 4, kind: input, shape index: {}]   ;;  %s692_s5 = inlined_call_operand.vmem [shape: f32[1,128], index: 5, kind: input, shape index: {}]   ;;  %s693_s6 = inlined_call_operand.vmem [shape: f32[1,128], index: 6, kind: input, shape index: {}]   ;;  %s694_s7 = inlined_call_operand.hbm [shape: f32[8,128], index: 7, kind: output, shape index: {}]  }
   0x1   :  { %13 = vsyncpa [#allocation6], 0 }
   0x2   :  { %14 = vsyncpa [#allocation4], 0  ;;  %s573_s24 = smov [#allocation5]   ;;  %s479_s28 = scalar_lea.hbm %s688_s1, 1024 }
   0x3   :  { %s30_s25 = sshll.u32 %s573_s24, 4  ;;  %p480_p0 = scmp.ne.s32.totalorder %s688_s1, %s479_s28  ;;  %s31_s25 = int_to_ptr.vmem [resolvable:$true] %s30_s25 }
   0x4   :  { %p483_p1 = scmp.lt.u32.totalorder %s479_s28, %s688_s1 }
   0x6   :  { %p485_p2 = pnand %p483_p1, %p480_p0 }
   0x8   :  { %488 = shalt.err (!%p485_p2)
}
   0x9   :  { %s489_s10 = scalar_lea.vmem %s31_s25, 1024  ;;  %p494_p4 = scmp.lt.s32.totalorder %s31_s25, %s31_s25 }
   0xa   :  { %p490_p3 = scmp.ne.s32.totalorder %s31_s25, %s489_s10  ;;  %p495_p5 = scmp.lt.s32.totalorder %s489_s10, %s489_s10 }
   0xc   :  { %p496_p6 = por %p495_p5, %p494_p4 }
   0xe   :  { %p497_p7 = pnand %p496_p6, %p490_p3 }
  0x10   :  { %500 = shalt.err (!%p497_p7)
}
  0x11   :  { %s574_s11 = smov 64   ;;  %s575_s12 = smov 4  }
  0x12   :  { %36 = dma.hbm_to_vmem [thread:$0]  %s688_s1, 1024, %s31_s25, [#allocation6], %s574_s11, %s574_s11, %s575_s12  }
  0x13   :  { %s576_s15 = smov [#allocation2]   ;;  %s577_s17 = smov [#allocation7]  }
  0x14   :  { %s21_s16 = sshll.u32 %s576_s15, 4  ;;  %s46_s18 = sshll.u32 %s577_s17, 4  ;;  %s22_s16 = int_to_ptr.vmem [resolvable:$true] %s21_s16  ;;  %s47_s18 = int_to_ptr.vmem [resolvable:$true] %s46_s18 }
  0x15   :  { %s501_s21 = scalar_lea.hbm %s687_s0, 64 }
  0x16   :  { %p502_p8 = scmp.ne.s32.totalorder %s687_s0, %s501_s21  ;;  %p505_p9 = scmp.lt.u32.totalorder %s501_s21, %s687_s0 }
  0x18   :  { %p507_p10 = pnand %p505_p9, %p502_p8 }
  0x1a   :  { %510 = shalt.err (!%p507_p10)
}
  0x1b   :  { %s511_s1 = scalar_lea.vmem %s22_s16, 64  ;;  %p516_p12 = scmp.lt.s32.totalorder %s22_s16, %s22_s16 }
  0x1c   :  { %p512_p11 = scmp.ne.s32.totalorder %s22_s16, %s511_s1  ;;  %p517_p13 = scmp.lt.s32.totalorder %s511_s1, %s511_s1 }
  0x1e   :  { %p518_p0 = por %p517_p13, %p516_p12 }
  0x20   :  { %p519_p1 = pnand %p518_p0, %p512_p11 }
  0x22   :  { %522 = shalt.err (!%p519_p1)
}
  0x23   :  { %24 = dma.hbm_to_vmem [thread:$0]  %s687_s0, 64, %s22_s16, [#allocation3]  }
  0x24   :  { %s523_s30 = scalar_lea.hbm %s691_s4, 1024 }
  0x25   :  { %p524_p2 = scmp.ne.s32.totalorder %s691_s4, %s523_s30  ;;  %p527_p3 = scmp.lt.u32.totalorder %s523_s30, %s691_s4 }
  0x27   :  { %p529_p4 = pnand %p527_p3, %p524_p2 }
  0x29   :  { %532 = shalt.err (!%p529_p4)
}
  0x2a   :  { %s533_s14 = scalar_lea.vmem %s47_s18, 1024  ;;  %p538_p6 = scmp.lt.s32.totalorder %s47_s18, %s47_s18 }
  0x2b   :  { %p534_p5 = scmp.ne.s32.totalorder %s47_s18, %s533_s14  ;;  %p539_p7 = scmp.lt.s32.totalorder %s533_s14, %s533_s14 }
  0x2d   :  { %p540_p8 = por %p539_p7, %p538_p6 }
  0x2f   :  { %p541_p9 = pnand %p540_p8, %p534_p5 }
  0x31   :  { %544 = shalt.err (!%p541_p9)
}
  0x32   :  { %52 = dma.hbm_to_vmem [thread:$0]  %s691_s4, 1024, %s47_s18, [#allocation6], %s574_s11, %s574_s11, %s575_s12  }
  0x33   :  { %567 = dma.done.wait [#allocation3], 64  }
  0x34   :  { %568 = vsyncadd [#allocation3], 4294967232 }
  0x35   :  { %569 = dma.done.wait [#allocation6], 2048  }
  0x36   :  { %570 = vsyncadd [#allocation6], 4294965248  ;;  %v578_v0 = vmov 0.0   ;;  %vm579_vm0 = vmmov 0   ;;  %v459_v1 = vld [vmem:[#allocation5] sm:$0xff]   ;;  %v460_v2 = vld [vmem:[#allocation5 + $0x8] sm:$0xff]  }
  0x37   :  { %411 = vmatprep.subr.bf16.mxu0 %v578_v0  ;;  %427 = vmatprep.mubr.msk.bf16.mxu0 %vm579_vm0, %v578_v0  ;;  %v461_v3 = vld [vmem:[#allocation5 + $0x10] sm:$0xff]   ;;  %v462_v4 = vld [vmem:[#allocation5 + $0x18] sm:$0xff]   ;;  %v463_v5 = vld [vmem:[#allocation5 + $0x20] sm:$0xff]   ;;  %s580_s19 = smov [#allocation8]  }
  0x38   :  { %431 = vmatprep.subr.bf16.mxu1 %v578_v0  ;;  %447 = vmatprep.mubr.msk.bf16.mxu1 %vm579_vm0, %v578_v0  ;;  %v464_v6 = vld [vmem:[#allocation5 + $0x28] sm:$0xff]   ;;  %v465_v7 = vld [vmem:[#allocation5 + $0x30] sm:$0xff]   ;;  %v466_v8 = vld [vmem:[#allocation5 + $0x38] sm:$0xff]   ;;  %s363_s20 = sshll.u32 %s580_s19, 4  ;;  %s364_s20 = int_to_ptr.vmem [resolvable:$true] %s363_s20 }
  0x39   :  { %412 = vmatpush3.bf16.msra.mxu0 %v459_v1  ;;  %v67_v9 = vld [vmem:[#allocation2] sm:$0xf]  ;;  %v467_v10 = vld [vmem:[#allocation7] sm:$0xff]   ;;  %v468_v11 = vld [vmem:[#allocation7 + $0x8] sm:$0xff]   ;;  %s545_s21 = scalar_lea.vmem %s364_s20, 128  ;;  %p550_p11 = scmp.lt.s32.totalorder %s364_s20, %s364_s20 }
  0x3a   :  { %413 = vmatprep.subr.bf16.mxu0 %v578_v0  ;;  %432 = vmatpush3.bf16.msra.mxu1 %v467_v10  ;;  %v469_v12 = vld [vmem:[#allocation7 + $0x10] sm:$0xff]   ;;  %v470_v13 = vld [vmem:[#allocation7 + $0x18] sm:$0xff]   ;;  %v471_v14 = vld [vmem:[#allocation7 + $0x20] sm:$0xff]   ;;  %p546_p10 = scmp.ne.s32.totalorder %s364_s20, %s545_s21  ;;  %p551_p12 = scmp.lt.s32.totalorder %s545_s21, %s545_s21 }
  0x3b   :  { %433 = vmatprep.subr.bf16.mxu1 %v578_v0  ;;  %v472_v15 = vld [vmem:[#allocation7 + $0x28] sm:$0xff]   ;;  %v473_v16 = vld [vmem:[#allocation7 + $0x30] sm:$0xff]   ;;  %v474_v17 = vld [vmem:[#allocation7 + $0x38] sm:$0xff]  }
  0x3c   :  { %v381_v43 = vld [vmem:[%s689_s2] ss:$0 sm:$0xff]  ;;  %p552_p13 = por %p551_p12, %p550_p11 }
  0x3d   :  { %414 = vmatpush3.bf16.msra.mxu0 %v460_v2  ;;  %v382_v45 = vld [vmem:[%s690_s3] ss:$0 sm:$0xff] }
  0x3e   :  { %415 = vmatprep.subr.bf16.mxu0 %v578_v0  ;;  %434 = vmatpush3.bf16.msra.mxu1 %v468_v11  ;;  %v391_v11 = vld [vmem:[%s692_s5] ss:$0 sm:$0xff]  ;;  %p553_p0 = pnand %p552_p13, %p546_p10 }
  0x3f   :  { %435 = vmatprep.subr.bf16.mxu1 %v578_v0 }
  0x41   :  { %416 = vmatpush3.bf16.msra.mxu0 %v461_v3 }
  0x42   :  { %417 = vmatprep.subr.bf16.mxu0 %v578_v0  ;;  %436 = vmatpush3.bf16.msra.mxu1 %v469_v12 }
  0x43   :  { %437 = vmatprep.subr.bf16.mxu1 %v578_v0 }
  0x45   :  { %418 = vmatpush3.bf16.msra.mxu0 %v462_v4 }
  0x46   :  { %419 = vmatprep.subr.bf16.mxu0 %v578_v0  ;;  %438 = vmatpush3.bf16.msra.mxu1 %v470_v13  ;;  %v392_v13 = vld [vmem:[%s693_s6] ss:$0 sm:$0xff] }
  0x47   :  { %439 = vmatprep.subr.bf16.mxu1 %v578_v0 }
  0x49   :  { %420 = vmatpush3.bf16.msra.mxu0 %v463_v5 }
  0x4a   :  { %421 = vmatprep.subr.bf16.mxu0 %v578_v0  ;;  %440 = vmatpush3.bf16.msra.mxu1 %v471_v14 }
  0x4b   :  { %441 = vmatprep.subr.bf16.mxu1 %v578_v0 }
  0x4d   :  { %422 = vmatpush3.bf16.msra.mxu0 %v464_v6 }
  0x4e   :  { %423 = vmatprep.subr.bf16.mxu0 %v578_v0  ;;  %442 = vmatpush3.bf16.msra.mxu1 %v472_v15 }
  0x4f   :  { %443 = vmatprep.subr.bf16.mxu1 %v578_v0 }
  0x51   :  { %424 = vmatpush3.bf16.msra.mxu0 %v465_v7 }
  0x52   :  { %425 = vmatprep.subr.bf16.mxu0 %v578_v0  ;;  %444 = vmatpush3.bf16.msra.mxu1 %v473_v16 }
  0x53   :  { %445 = vmatprep.subr.bf16.mxu1 %v578_v0 }
  0x55   :  { %426 = vmatpush3.bf16.msra.mxu0 %v466_v8 }
  0x56   :  { %446 = vmatpush3.bf16.msra.mxu1 %v474_v17 }
  0x58   :  { %428 = vmatmul.mubr.bf16.vlgmr.msra.gmra.mrb[0].mxu0 %v67_v9 }
 0x12b   :  { %v166_v18 = vpop.f32.mrb[0].mxu0 }
 0x12c   :  { %v174_v19 = vrot.slane %v166_v18, 4  ;;  %v182_v20 = vmul.f32 %v166_v18, %v166_v18  ;;  %v429_v21 = vpop.f32.mrb[1].mxu0 }
 0x12d   :  { %v169_v22 = vpop.f32.mrb[2].mxu0 }
 0x12e   :  { %v175_v23 = vadd.f32 %v174_v19, %v166_v18  ;;  %v183_v24 = vrot.slane %v182_v20, 4  ;;  %v430_v25 = vpop.f32.mrb[3].mxu0 }
 0x130   :  { %v176_v26 = vrot.slane %v175_v23, 2  ;;  %v184_v27 = vadd.f32 %v183_v24, %v182_v20 }
 0x132   :  { %v177_v28 = vadd.f32 %v176_v26, %v175_v23  ;;  %v185_v29 = vrot.slane %v184_v27, 2 }
 0x134   :  { %v178_v30 = vrot.slane %v177_v28, 1  ;;  %v186_v31 = vadd.f32 %v185_v29, %v184_v27 }
 0x136   :  { %v179_v32 = vadd.f32 %v178_v30, %v177_v28  ;;  %v187_v33 = vrot.slane %v186_v31, 1 }
 0x138   :  { %v181_v34 = vmul.f32 0.125, %v179_v32  ;;  %v188_v35 = vadd.f32 %v187_v33, %v186_v31 }
 0x13a   :  { %v189_v36 = vmul.f32 0.125, %v188_v35  ;;  %v190_v37 = vmul.f32 %v181_v34, %v181_v34  ;;  %v193_v41 = vsub.f32 %v166_v18, %v181_v34 }
 0x13c   :  { %v191_v38 = vsub.f32 %v189_v36, %v190_v37 }
 0x13e   :  { %v192_v39 = vmax.f32 %v191_v38, 0.0 }
 0x140   :  { %v194_v40 = vadd.f32 1e-05, %v192_v39 }
 0x142   :  { %475 = vrsqrt.f32 %v194_v40 }
 0x14c   :  { %v476_v42 = vpop.eup %475 }
 0x14d   :  { %v196_v44 = vmul.f32 %v476_v42, %v193_v41 }
 0x14f   :  { %v203_v46 = vmul.f32 %v381_v43, %v196_v44 }
 0x151   :  { %v210_v47 = vadd.f32 %v382_v45, %v203_v46 }
 0x153   :  { %v211_v48 = vmax.f32 %v210_v47, 0.0 }
 0x155   :  { %v212_v49 = vpack.c.bf16 %v211_v48, %v211_v48 }
 0x157   :  { %448 = vmatmul.mubr.bf16.vlgmr.msra.gmra.mrb[0].mxu1 %v212_v49 }
 0x22a   :  { %v311_v50 = vpop.f32.mrb[0].mxu1 }
 0x22b   :  { %v319_v51 = vrot.slane %v311_v50, 4  ;;  %v326_v52 = vmul.f32 %v311_v50, %v311_v50  ;;  %v449_v53 = vpop.f32.mrb[1].mxu1 }
 0x22c   :  { %v314_v54 = vpop.f32.mrb[2].mxu1 }
 0x22d   :  { %v320_v55 = vadd.f32 %v319_v51, %v311_v50  ;;  %v327_v56 = vrot.slane %v326_v52, 4  ;;  %v450_v57 = vpop.f32.mrb[3].mxu1 }
 0x22f   :  { %v321_v58 = vrot.slane %v320_v55, 2  ;;  %v328_v59 = vadd.f32 %v327_v56, %v326_v52 }
 0x231   :  { %v322_v60 = vadd.f32 %v321_v58, %v320_v55  ;;  %v329_v61 = vrot.slane %v328_v59, 2 }
 0x233   :  { %v323_v62 = vrot.slane %v322_v60, 1  ;;  %v330_v63 = vadd.f32 %v329_v61, %v328_v59 }
 0x235   :  { %v324_v0 = vadd.f32 %v323_v62, %v322_v60  ;;  %v331_v1 = vrot.slane %v330_v63, 1 }
 0x237   :  { %v325_v2 = vmul.f32 0.125, %v324_v0  ;;  %v332_v3 = vadd.f32 %v331_v1, %v330_v63 }
 0x239   :  { %v333_v4 = vmul.f32 0.125, %v332_v3  ;;  %v334_v5 = vmul.f32 %v325_v2, %v325_v2  ;;  %v337_v9 = vsub.f32 %v311_v50, %v325_v2 }
 0x23b   :  { %v335_v6 = vsub.f32 %v333_v4, %v334_v5 }
 0x23d   :  { %v336_v7 = vmax.f32 %v335_v6, 0.0 }
 0x23f   :  { %v338_v8 = vadd.f32 1e-05, %v336_v7 }
 0x241   :  { %477 = vrsqrt.f32 %v338_v8 }
 0x24b   :  { %v478_v10 = vpop.eup %477 }
 0x24c   :  { %v340_v12 = vmul.f32 %v478_v10, %v337_v9 }
 0x24e   :  { %v347_v14 = vmul.f32 %v391_v11, %v340_v12 }
 0x250   :  { %v354_v15 = vadd.f32 %v392_v13, %v347_v14 }
 0x252   :  { %v355_v16 = vmax.f32 %v354_v15, 0.0 }
 0x254   :  { %356 = vst [vmem:[#allocation8] sm:$0xff] %v355_v16 }
 0x255   :  { %556 = shalt.err (!%p553_p0)
}
 0x256   :  { %s557_s23 = scalar_lea.hbm %s694_s7, 128 }
 0x257   :  { %p558_p1 = scmp.ne.s32.totalorder %s694_s7, %s557_s23  ;;  %p561_p2 = scmp.lt.u32.totalorder %s557_s23, %s694_s7 }
 0x259   :  { %p563_p3 = pnand %p561_p2, %p558_p1 }
 0x25b   :  { %566 = shalt.err (!%p563_p3)
}
 0x25c   :  { %366 = dma.vmem_to_hbm [thread:$0]  %s364_s20, 128, %s694_s7, [#allocation4]  }
 0x25d   :  { %571 = dma.done.wait [#allocation4], 128  }
 0x25e   :  { %572 = vsyncadd [#allocation4], 4294967168 }
 0x25f   :  { %370 = vsyncpa [#allocation3], 1 }
 0x260   :  { %371 = vsyncpa [#allocation6], 1 }
 0x261   :  { %372 = vsyncpa [#allocation4], 1 }

</bundles_post_ra>
